<compile_context>
chip_gen: v7x
topology: tpu7x:2x2x1
jax: 0.10.0
libtpu: 0.0.40
codegen_flags: <defaults>
</compile_context>

<pallas_src>
import jax
import jax.numpy as jnp
from jax.experimental import pallas as pl
from jax.experimental.pallas import tpu as pltpu

_LANE = 128
_TARGET_STEP_BYTES = 2 << 20      # ~2 MiB of embedding data per grid step
_VMEM_TILE_BUDGET = 24 << 20      # 2 inputs x 2 pipeline buffers must fit here
_VMEM_LIMIT_BYTES = 32 << 20      # safe on v5e/v6e/v7x, above v5e's 16 MiB default
_MAX_TB = 8192


def _round_up(x, m):
    return ((x + m - 1) // m) * m


def _cdiv(a, b):
    return (a + b - 1) // b


# ----------------------------------------------------------------------------
# Pallas kernel: bilinear score on [tb, D] slabs (batch on sublanes, D on lanes).
#   u_ref, v_ref : (tb, D)
#   ub_ref, vb_ref, o_ref : (tb, 1)
# ----------------------------------------------------------------------------
def _bilinear_kernel(u_ref, v_ref, ub_ref, vb_ref, o_ref):
    u = u_ref[...].astype(jnp.float32)
    v = v_ref[...].astype(jnp.float32)
    dot = jnp.sum(u * v, axis=-1, keepdims=True)          # (tb, 1), XLU reduce
    o_ref[...] = (dot
                  + ub_ref[...].astype(jnp.float32)
                  + vb_ref[...].astype(jnp.float32))


def _bilinear_score(u, v, ub, vb, *, tb):
    """u, v: [Bp, D]; ub, vb: [Bp, 1].  Requires Bp % tb == 0, tb % 128 == 0."""
    bp, d = u.shape
    dtype_bytes = u.dtype.itemsize
    grid = (bp // tb,)
    emb_spec = pl.BlockSpec((tb, d), lambda i: (i, 0))
    vec_spec = pl.BlockSpec((tb, 1), lambda i: (i, 0))

    cost = pl.CostEstimate(
        flops=2 * bp * d,
        transcendentals=0,
        bytes_accessed=2 * bp * d * dtype_bytes + 3 * bp * 4,
    )

    return pl.pallas_call(
        _bilinear_kernel,
        out_shape=jax.ShapeDtypeStruct((bp, 1), jnp.float32),
        grid_spec=pltpu.PrefetchScalarGridSpec(
            num_scalar_prefetch=0,
            grid=grid,
            in_specs=[emb_spec, emb_spec, vec_spec, vec_spec],
            out_specs=vec_spec,
        ),
        compiler_params=pltpu.CompilerParams(
            dimension_semantics=("parallel",),   # shards tiles across v7x's 2 TCs
            vmem_limit_bytes=_VMEM_LIMIT_BYTES,
        ),
        cost_estimate=cost,
    )(u, v, ub, vb)


def _choose_tiling(b, d, dtype_bytes):
    """Pick (tb, bp) with tb % 128 == 0 and bp % tb == 0."""
    bp0 = _round_up(max(b, 1), _LANE)

    # Big enough to amortize per-step overhead...
    tb = _round_up(max(_TARGET_STEP_BYTES // (2 * d * dtype_bytes), 1), _LANE)
    # ...but small enough that 2 inputs x 2 pipeline buffers fit the VMEM budget.
    tb_cap = max((_VMEM_TILE_BUDGET // (4 * d * dtype_bytes)) // _LANE * _LANE, _LANE)
    tb = max(min(tb, tb_cap, _MAX_TB), _LANE)

    if bp0 <= tb:
        # Small batch: keep >=2 tiles when possible so both v7x TensorCores run
        # and the pipeline retains prefetch/writeback overlap.
        if bp0 >= 2 * _LANE:
            tb = _round_up(_cdiv(bp0, 2), _LANE)
        else:
            tb = bp0
    bp = _round_up(bp0, tb)
    return tb, bp


# ----------------------------------------------------------------------------
# BilinearNet wrapper (parameter init + forward)
# ----------------------------------------------------------------------------
def init_bilinear_params(key, num_users, num_items, embedding_dim, dtype=jnp.float32):
    ku, ki = jax.random.split(key)
    # ScaledEmbedding: weight ~ Normal(0, 1/embedding_dim)
    user_emb = (jax.random.normal(ku, (num_users, embedding_dim), jnp.float32)
                / embedding_dim).astype(dtype)
    item_emb = (jax.random.normal(ki, (num_items, embedding_dim), jnp.float32)
                / embedding_dim).astype(dtype)
    # ZeroEmbedding: zeros
    user_bias = jnp.zeros((num_users, 1), dtype)
    item_bias = jnp.zeros((num_items, 1), dtype)
    return dict(user_emb=user_emb, item_emb=item_emb,
                user_bias=user_bias, item_bias=item_bias)


@jax.jit
def bilinear_forward(params, user_ids, item_ids):
    b = user_ids.shape[0]
    d = params["user_emb"].shape[1]
    dtype_bytes = params["user_emb"].dtype.itemsize

    tb, bp = _choose_tiling(b, d, dtype_bytes)
    pad = bp - b

    # Pad the cheap int32 ids (zero-padding = valid clamped index 0), never the
    # gathered [Bp, D] arrays; padded lanes are sliced off at the end.
    uid = jnp.pad(user_ids, (0, pad)) if pad else user_ids
    iid = jnp.pad(item_ids, (0, pad)) if pad else item_ids

    # Embedding gather (plain-JAX glue), consumed by the kernel as-is (no .T).
    u = params["user_emb"][uid]          # [Bp, D]
    v = params["item_emb"][iid]          # [Bp, D]
    ub = params["user_bias"][uid]        # [Bp, 1]
    vb = params["item_bias"][iid]        # [Bp, 1]

    out = _bilinear_score(u, v, ub, vb, tb=tb)   # [Bp, 1] f32
    # NOTE: output is f32 even when tables are bf16 (accumulation dtype).
    return out[:b, 0]                            # [B]


if __name__ == "__main__":
    NUM_USERS, NUM_ITEMS, EMB_DIM, BATCH = 16, 24, 32, 8

    key = jax.random.PRNGKey(0)
    kp, ku, ki = jax.random.split(key, 3)

    params = init_bilinear_params(kp, NUM_USERS, NUM_ITEMS, EMB_DIM)
    user_ids = jax.random.randint(ku, (BATCH,), 0, NUM_USERS, dtype=jnp.int32)
    item_ids = jax.random.randint(ki, (BATCH,), 0, NUM_ITEMS, dtype=jnp.int32)

    pred = bilinear_forward(params, user_ids, item_ids)
    pred = jax.block_until_ready(pred)

    # Pure-JAX reference check of the forward semantics.
    u = params["user_emb"][user_ids].astype(jnp.float32)
    v = params["item_emb"][item_ids].astype(jnp.float32)
    ref = ((u * v).sum(1)
           + params["user_bias"][user_ids, 0].astype(jnp.float32)
           + params["item_bias"][item_ids, 0].astype(jnp.float32))
    assert pred.shape == (BATCH,)
    assert jnp.allclose(pred, ref, atol=1e-5, rtol=1e-5)

    print("KERNEL_OK")
</pallas_src>

<mosaic_0001>
module attributes {stable_mosaic.version = 11 : i64} {
  func.func @_bilinear_kernel(%arg0: i32, %arg1: memref<128x32xf32, #tpu.memory_space<vmem>>, %arg2: memref<128x32xf32, #tpu.memory_space<vmem>>, %arg3: memref<128x1xf32, #tpu.memory_space<vmem>>, %arg4: memref<128x1xf32, #tpu.memory_space<vmem>>, %arg5: memref<128x1xf32, #tpu.memory_space<vmem>>) attributes {dimension_semantics = [#tpu.dimension_semantics<parallel>], iteration_bounds = array<i64: 1>, scalar_prefetch = 0 : i64, scratch_operands = 0 : i64, tpu.core_type = #tpu.core_type<tc>, window_params = [{transform_indices = @transform_0, window_bounds = array<i64: 128, 32>}, {transform_indices = @transform_1, window_bounds = array<i64: 128, 32>}, {transform_indices = @transform_2, window_bounds = array<i64: 128, 1>}, {transform_indices = @transform_3, window_bounds = array<i64: 128, 1>}, {transform_indices = @transform_4, window_bounds = array<i64: 128, 1>}]} {
    %c0 = arith.constant 0 : index
    %c0_0 = arith.constant 0 : index
    %0 = vector.load %arg1[%c0, %c0_0] : memref<128x32xf32, #tpu.memory_space<vmem>>, vector<128x32xf32>
    %c0_1 = arith.constant 0 : index
    %c0_2 = arith.constant 0 : index
    %1 = vector.load %arg2[%c0_1, %c0_2] : memref<128x32xf32, #tpu.memory_space<vmem>>, vector<128x32xf32>
    %2 = arith.mulf %0, %1 : vector<128x32xf32>
    %cst = arith.constant dense<0.000000e+00> : vector<128xf32>
    %3 = vector.multi_reduction <add>, %2, %cst [1] : vector<128x32xf32> to vector<128xf32>
    %4 = vector.shape_cast %3 : vector<128xf32> to vector<128x1xf32>
    %c0_3 = arith.constant 0 : index
    %c0_4 = arith.constant 0 : index
    %5 = vector.load %arg3[%c0_3, %c0_4] : memref<128x1xf32, #tpu.memory_space<vmem>>, vector<128x1xf32>
    %6 = arith.addf %4, %5 : vector<128x1xf32>
    %c0_5 = arith.constant 0 : index
    %c0_6 = arith.constant 0 : index
    %7 = vector.load %arg4[%c0_5, %c0_6] : memref<128x1xf32, #tpu.memory_space<vmem>>, vector<128x1xf32>
    %8 = arith.addf %6, %7 : vector<128x1xf32>
    %c0_7 = arith.constant 0 : index
    %c0_8 = arith.constant 0 : index
    %9 = vector.load %arg5[%c0_7, %c0_8] : memref<128x1xf32, #tpu.memory_space<vmem>>, vector<128x1xf32>
    tpu.vector_store %arg5[%c0_7, %c0_8], %8 {strides = array<i32>} : memref<128x1xf32, #tpu.memory_space<vmem>>, vector<128x1xf32>,
    return
  }
  func.func @transform_0(%arg0: i32) -> (i32, i32) {
    %c0_i32 = arith.constant 0 : i32
    %c0_i32_0 = arith.constant 0 : i32
    return %arg0, %c0_i32 : i32, i32
  }
  func.func @transform_1(%arg0: i32) -> (i32, i32) {
    %c0_i32 = arith.constant 0 : i32
    %c0_i32_0 = arith.constant 0 : i32
    return %arg0, %c0_i32 : i32, i32
  }
  func.func @transform_2(%arg0: i32) -> (i32, i32) {
    %c0_i32 = arith.constant 0 : i32
    %c0_i32_0 = arith.constant 0 : i32
    return %arg0, %c0_i32 : i32, i32
  }
  func.func @transform_3(%arg0: i32) -> (i32, i32) {
    %c0_i32 = arith.constant 0 : i32
    %c0_i32_0 = arith.constant 0 : i32
    return %arg0, %c0_i32 : i32, i32
  }
  func.func @transform_4(%arg0: i32) -> (i32, i32) {
    %c0_i32 = arith.constant 0 : i32
    %c0_i32_0 = arith.constant 0 : i32
    return %arg0, %c0_i32 : i32, i32
  }
}

</mosaic_0001>

<bundles_post_ra>
// kernel: bilinear_forward.1
= control target key start
LH: loop header
LB: loop body
LE: loop exit
PB: predicated region body
PF: predicated region fallthrough
CT: control target
= control target key end

     0   :  { %vm65_vm0 = vcmask 261120   ;;  %vm178_vm1 = vcmask 7168   ;;  %s496_s0 = inlined_call_operand.vmem [shape: f32[128,32], index: 0, kind: input, shape index: {}]   ;;  %s497_s1 = inlined_call_operand.vmem [shape: f32[128,32], index: 1, kind: input, shape index: {}]   ;;  %s498_s2 = inlined_call_operand.vmem [shape: f32[128,1], index: 2, kind: input, shape index: {}]   ;;  %s499_s3 = inlined_call_operand.vmem [shape: f32[128,1], index: 3, kind: input, shape index: {}]   ;;  %s500_s4 = inlined_call_operand.vmem [shape: f32[128,1], index: 4, kind: output, shape index: {}]  }
   0x1   :  { %v19_v0 = vld [vmem:[%s496_s0 + $0x10] sm:$0xff]  ;;  %v17_v2 = vld [vmem:[%s496_s0] sm:$0xff]  ;;  %v20_v5 = vld [vmem:[%s496_s0 + $0x18] sm:$0xff] }
   0x2   :  { %v35_v1 = vld [vmem:[%s497_s1 + $0x10] sm:$0xff]  ;;  %v33_v4 = vld [vmem:[%s497_s1] sm:$0xff]  ;;  %v36_v6 = vld [vmem:[%s497_s1 + $0x18] sm:$0xff] }
   0x3   :  { %v51_v3 = vmul.f32 %v35_v1, %v19_v0  ;;  %v49_v7 = vmul.f32 %v33_v4, %v17_v2  ;;  %v52_v8 = vmul.f32 %v36_v6, %v20_v5  ;;  %v18_v9 = vld [vmem:[%s496_s0 + $0x8] sm:$0xff]  ;;  %v21_v15 = vld [vmem:[%s496_s0 + $0x20] sm:$0xff]  ;;  %v24_v22 = vld [vmem:[%s496_s0 + $0x38] sm:$0xff] }
   0x4   :  { %v34_v10 = vld [vmem:[%s497_s1 + $0x8] sm:$0xff]  ;;  %v37_v16 = vld [vmem:[%s497_s1 + $0x20] sm:$0xff]  ;;  %v40_v23 = vld [vmem:[%s497_s1 + $0x38] sm:$0xff] }
   0x5   :  { %v22_v11 = vld [vmem:[%s496_s0 + $0x28] sm:$0xff]  ;;  %v72_v12 = vsel %vm65_vm0, %v51_v3, 0.0  ;;  %v50_v13 = vmul.f32 %v34_v10, %v18_v9  ;;  %v66_v17 = vsel %vm65_vm0, %v49_v7, 0.0  ;;  %v75_v18 = vsel %vm65_vm0, %v52_v8, 0.0  ;;  %v23_v24 = vld [vmem:[%s496_s0 + $0x30] sm:$0xff]  ;;  %v25_v32 = vld [vmem:[%s496_s0 + $0x40] sm:$0xff] }
   0x6   :  { %v38_v14 = vld [vmem:[%s497_s1 + $0x28] sm:$0xff]  ;;  %73 = vadd.xlane.f32.xlu1 %v72_v12  ;;  %67 = vadd.xlane.f32.xlu0 %v66_v17  ;;  %v53_v21 = vmul.f32 %v37_v16, %v21_v15  ;;  %v39_v25 = vld [vmem:[%s497_s1 + $0x30] sm:$0xff]  ;;  %v56_v27 = vmul.f32 %v40_v23, %v24_v22  ;;  %v41_v33 = vld [vmem:[%s497_s1 + $0x40] sm:$0xff] }
   0x7   :  { %v54_v19 = vmul.f32 %v38_v14, %v22_v11  ;;  %v69_v20 = vsel %vm65_vm0, %v50_v13, 0.0  ;;  %v55_v29 = vmul.f32 %v39_v25, %v23_v24  ;;  %v26_v30 = vld [vmem:[%s496_s0 + $0x48] sm:$0xff]  ;;  %v57_v37 = vmul.f32 %v41_v33, %v25_v32  ;;  %v28_v38 = vld [vmem:[%s496_s0 + $0x58] sm:$0xff]  ;;  %v27_v40 = vld [vmem:[%s496_s0 + $0x50] sm:$0xff] }
   0x8   :  { %v78_v28 = vsel %vm65_vm0, %v53_v21, 0.0  ;;  %v42_v31 = vld [vmem:[%s497_s1 + $0x48] sm:$0xff]  ;;  %v87_v34 = vsel %vm65_vm0, %v56_v27, 0.0  ;;  %v44_v39 = vld [vmem:[%s497_s1 + $0x58] sm:$0xff]  ;;  %v43_v41 = vld [vmem:[%s497_s1 + $0x50] sm:$0xff] }
   0x9   :  { %v81_v26 = vsel %vm65_vm0, %v54_v19, 0.0  ;;  %v58_v35 = vmul.f32 %v42_v31, %v26_v30  ;;  %v84_v36 = vsel %vm65_vm0, %v55_v29, 0.0  ;;  %v60_v43 = vmul.f32 %v44_v39, %v28_v38  ;;  %v30_v46 = vld [vmem:[%s496_s0 + $0x68] sm:$0xff]  ;;  %v29_v48 = vld [vmem:[%s496_s0 + $0x60] sm:$0xff]  ;;  %v32_v54 = vld [vmem:[%s496_s0 + $0x78] sm:$0xff] }
   0xa   :  { %76 = vadd.xlane.f32.xlu1 %v75_v18  ;;  %70 = vadd.xlane.f32.xlu0 %v69_v20  ;;  %v90_v44 = vsel %vm65_vm0, %v57_v37, 0.0  ;;  %v59_v45 = vmul.f32 %v43_v41, %v27_v40  ;;  %v46_v47 = vld [vmem:[%s497_s1 + $0x68] sm:$0xff]  ;;  %v45_v49 = vld [vmem:[%s497_s1 + $0x60] sm:$0xff]  ;;  %v48_v55 = vld [vmem:[%s497_s1 + $0x78] sm:$0xff] }
   0xb   :  { %v93_v42 = vsel %vm65_vm0, %v58_v35, 0.0  ;;  %v99_v50 = vsel %vm65_vm0, %v60_v43, 0.0  ;;  %v62_v51 = vmul.f32 %v46_v47, %v30_v46  ;;  %v61_v53 = vmul.f32 %v45_v49, %v29_v48  ;;  %v31_v56 = vld [vmem:[%s496_s0 + $0x70] sm:$0xff]  ;;  %v114_v1 = vld [vmem:[%s498_s2] sm:$0xff]  ;;  %v117_v8 = vld [vmem:[%s498_s2 + $0x18] sm:$0xff] }
   0xc   :  { %v96_v52 = vsel %vm65_vm0, %v59_v45, 0.0  ;;  %v47_v57 = vld [vmem:[%s497_s1 + $0x70] sm:$0xff]  ;;  %v64_v59 = vmul.f32 %v48_v55, %v32_v54  ;;  %v146_v5 = vld [vmem:[%s499_s3] sm:$0xff]  ;;  %v115_v10 = vld [vmem:[%s498_s2 + $0x8] sm:$0xff] }
   0xd   :  { %v105_v58 = vsel %vm65_vm0, %v62_v51, 0.0  ;;  %v102_v60 = vsel %vm65_vm0, %v61_v53, 0.0  ;;  %v63_v61 = vmul.f32 %v47_v57, %v31_v56  ;;  %v116_v0 = vld [vmem:[%s498_s2 + $0x10] sm:$0xff]  ;;  %v149_v12 = vld [vmem:[%s499_s3 + $0x18] sm:$0xff]  ;;  %v147_v15 = vld [vmem:[%s499_s3 + $0x8] sm:$0xff] }
   0xe   :  { %82 = vadd.xlane.f32.xlu1 %v81_v26  ;;  %79 = vadd.xlane.f32.xlu0 %v78_v28  ;;  %v111_v62 = vsel %vm65_vm0, %v64_v59, 0.0  ;;  %v148_v2 = vld [vmem:[%s499_s3 + $0x10] sm:$0xff]  ;;  %v119_v18 = vld [vmem:[%s498_s2 + $0x28] sm:$0xff]  ;;  %v118_v20 = vld [vmem:[%s498_s2 + $0x20] sm:$0xff] }
   0xf   :  { %v108_v63 = vsel %vm65_vm0, %v63_v61, 0.0  ;;  %v151_v22 = vld [vmem:[%s499_s3 + $0x28] sm:$0xff]  ;;  %v150_v25 = vld [vmem:[%s499_s3 + $0x20] sm:$0xff]  ;;  %v121_v28 = vld [vmem:[%s498_s2 + $0x38] sm:$0xff] }
  0x10   :  { %v120_v30 = vld [vmem:[%s498_s2 + $0x30] sm:$0xff]  ;;  %v153_v32 = vld [vmem:[%s499_s3 + $0x38] sm:$0xff]  ;;  %v123_v38 = vld [vmem:[%s498_s2 + $0x48] sm:$0xff] }
  0x11   :  { %v152_v35 = vld [vmem:[%s499_s3 + $0x30] sm:$0xff]  ;;  %v122_v40 = vld [vmem:[%s498_s2 + $0x40] sm:$0xff]  ;;  %v125_v48 = vld [vmem:[%s498_s2 + $0x58] sm:$0xff] }
  0x12   :  { %88 = vadd.xlane.f32.xlu1 %v87_v34  ;;  %85 = vadd.xlane.f32.xlu0 %v84_v36  ;;  %v154_v45 = vld [vmem:[%s499_s3 + $0x40] sm:$0xff]  ;;  %v156_v55 = vld [vmem:[%s499_s3 + $0x50] sm:$0xff] }
  0x16   :  { %94 = vadd.xlane.f32.xlu1 %v93_v42  ;;  %91 = vadd.xlane.f32.xlu0 %v90_v44  ;;  %v155_v42 = vld [vmem:[%s499_s3 + $0x48] sm:$0xff] }
  0x1a   :  { %100 = vadd.xlane.f32.xlu1 %v99_v50  ;;  %97 = vadd.xlane.f32.xlu0 %v96_v52  ;;  %v124_v50 = vld [vmem:[%s498_s2 + $0x50] sm:$0xff]  ;;  %v157_v52 = vld [vmem:[%s499_s3 + $0x58] sm:$0xff] }
  0x1e   :  { %106 = vadd.xlane.f32.xlu1 %v105_v58  ;;  %103 = vadd.xlane.f32.xlu0 %v102_v60  ;;  %v127_v58 = vld [vmem:[%s498_s2 + $0x68] sm:$0xff]  ;;  %v126_v60 = vld [vmem:[%s498_s2 + $0x60] sm:$0xff] }
  0x22   :  { %112 = vadd.xlane.f32.xlu1 %v111_v62  ;;  %109 = vadd.xlane.f32.xlu0 %v108_v63  ;;  %v159_v62 = vld [vmem:[%s499_s3 + $0x68] sm:$0xff] }
  0x93   :  { %v74_v3 = vpop.xlane.xlu1 %73  ;;  %v68_v6 = vpop.xlane.xlu0 %67 }
  0x94   :  { %v132_v4 = vadd.f32 %v116_v0, %v74_v3  ;;  %v130_v7 = vadd.f32 %v114_v1, %v68_v6  ;;  %v158_v1 = vld [vmem:[%s499_s3 + $0x60] sm:$0xff]  ;;  %v128_v6 = vld [vmem:[%s498_s2 + $0x70] sm:$0xff] }
  0x96   :  { %v164_v9 = vadd.f32 %v148_v2, %v132_v4  ;;  %v162_v11 = vadd.f32 %v146_v5, %v130_v7  ;;  %v129_v4 = vld [vmem:[%s498_s2 + $0x78] sm:$0xff] }
  0x97   :  { %v77_v13 = vpop.xlane.xlu1 %76  ;;  %v71_v16 = vpop.xlane.xlu0 %70 }
  0x98   :  { %181 = vst.msk [vmem:[%s500_s4 + $0x10] sm:$0xff] %vm178_vm1, %v164_v9  ;;  %v133_v14 = vadd.f32 %v117_v8, %v77_v13  ;;  %179 = vst.msk [vmem:[%s500_s4] sm:$0xff] %vm178_vm1, %v162_v11  ;;  %v131_v17 = vadd.f32 %v115_v10, %v71_v16  ;;  %v161_v8 = vld [vmem:[%s499_s3 + $0x78] sm:$0xff]  ;;  %v160_v11 = vld [vmem:[%s499_s3 + $0x70] sm:$0xff] }
  0x9a   :  { %v165_v19 = vadd.f32 %v149_v12, %v133_v14  ;;  %v163_v21 = vadd.f32 %v147_v15, %v131_v17 }
  0x9b   :  { %v83_v23 = vpop.xlane.xlu1 %82  ;;  %v80_v26 = vpop.xlane.xlu0 %79 }
  0x9c   :  { %182 = vst.msk [vmem:[%s500_s4 + $0x18] sm:$0xff] %vm178_vm1, %v165_v19  ;;  %v135_v24 = vadd.f32 %v119_v18, %v83_v23  ;;  %180 = vst.msk [vmem:[%s500_s4 + $0x8] sm:$0xff] %vm178_vm1, %v163_v21  ;;  %v134_v27 = vadd.f32 %v118_v20, %v80_v26 }
  0x9e   :  { %v167_v29 = vadd.f32 %v151_v22, %v135_v24  ;;  %v166_v31 = vadd.f32 %v150_v25, %v134_v27 }
  0x9f   :  { %v89_v33 = vpop.xlane.xlu1 %88  ;;  %v86_v36 = vpop.xlane.xlu0 %85 }
  0xa0   :  { %184 = vst.msk [vmem:[%s500_s4 + $0x28] sm:$0xff] %vm178_vm1, %v167_v29  ;;  %v137_v34 = vadd.f32 %v121_v28, %v89_v33  ;;  %183 = vst.msk [vmem:[%s500_s4 + $0x20] sm:$0xff] %vm178_vm1, %v166_v31  ;;  %v136_v37 = vadd.f32 %v120_v30, %v86_v36 }
  0xa2   :  { %v169_v39 = vadd.f32 %v153_v32, %v137_v34  ;;  %v168_v41 = vadd.f32 %v152_v35, %v136_v37 }
  0xa3   :  { %v95_v43 = vpop.xlane.xlu1 %94  ;;  %v92_v46 = vpop.xlane.xlu0 %91 }
  0xa4   :  { %186 = vst.msk [vmem:[%s500_s4 + $0x38] sm:$0xff] %vm178_vm1, %v169_v39  ;;  %v139_v44 = vadd.f32 %v123_v38, %v95_v43  ;;  %185 = vst.msk [vmem:[%s500_s4 + $0x30] sm:$0xff] %vm178_vm1, %v168_v41  ;;  %v138_v47 = vadd.f32 %v122_v40, %v92_v46 }
  0xa6   :  { %v171_v49 = vadd.f32 %v155_v42, %v139_v44  ;;  %v170_v51 = vadd.f32 %v154_v45, %v138_v47 }
  0xa7   :  { %v101_v53 = vpop.xlane.xlu1 %100  ;;  %v98_v56 = vpop.xlane.xlu0 %97 }
  0xa8   :  { %188 = vst.msk [vmem:[%s500_s4 + $0x48] sm:$0xff] %vm178_vm1, %v171_v49  ;;  %v141_v54 = vadd.f32 %v125_v48, %v101_v53  ;;  %187 = vst.msk [vmem:[%s500_s4 + $0x40] sm:$0xff] %vm178_vm1, %v170_v51  ;;  %v140_v57 = vadd.f32 %v124_v50, %v98_v56 }
  0xaa   :  { %v173_v59 = vadd.f32 %v157_v52, %v141_v54  ;;  %v172_v61 = vadd.f32 %v156_v55, %v140_v57 }
  0xab   :  { %v107_v63 = vpop.xlane.xlu1 %106  ;;  %v104_v2 = vpop.xlane.xlu0 %103 }
  0xac   :  { %190 = vst.msk [vmem:[%s500_s4 + $0x58] sm:$0xff] %vm178_vm1, %v173_v59  ;;  %v143_v0 = vadd.f32 %v127_v58, %v107_v63  ;;  %189 = vst.msk [vmem:[%s500_s4 + $0x50] sm:$0xff] %vm178_vm1, %v172_v61  ;;  %v142_v3 = vadd.f32 %v126_v60, %v104_v2 }
  0xae   :  { %v175_v5 = vadd.f32 %v159_v62, %v143_v0  ;;  %v174_v7 = vadd.f32 %v158_v1, %v142_v3 }
  0xaf   :  { %v113_v9 = vpop.xlane.xlu1 %112  ;;  %v110_v12 = vpop.xlane.xlu0 %109 }
  0xb0   :  { %192 = vst.msk [vmem:[%s500_s4 + $0x68] sm:$0xff] %vm178_vm1, %v175_v5  ;;  %v145_v10 = vadd.f32 %v129_v4, %v113_v9  ;;  %191 = vst.msk [vmem:[%s500_s4 + $0x60] sm:$0xff] %vm178_vm1, %v174_v7  ;;  %v144_v13 = vadd.f32 %v128_v6, %v110_v12 }
  0xb2   :  { %v177_v14 = vadd.f32 %v161_v8, %v145_v10  ;;  %v176_v15 = vadd.f32 %v160_v11, %v144_v13 }
  0xb4   :  { %194 = vst.msk [vmem:[%s500_s4 + $0x78] sm:$0xff] %vm178_vm1, %v177_v14  ;;  %193 = vst.msk [vmem:[%s500_s4 + $0x70] sm:$0xff] %vm178_vm1, %v176_v15 }

</bundles_post_ra>
